<compile_context>
chip_gen: v6e
topology: v6e:2x2x1
jax: 0.10.0
libtpu: 0.0.40
codegen_flags: <defaults>
</compile_context>

<pallas_src>
import functools
import math

import jax
import jax.numpy as jnp
from jax.experimental import pallas as pl
from jax.experimental.pallas import tpu as pltpu


# ----------------------------------------------------------------------------
# Sizing helpers.
# ----------------------------------------------------------------------------
def _vmem_capacity_bytes():
    try:
        return int(pltpu.get_tpu_info().vmem_capacity_bytes)
    except Exception:
        return 64 << 20          # conservative fallback (v7x per-core VMEM)


def _choose_group(B, H, L, D, *, in_itemsize, out_itemsize, n_inputs, budget):
    """Heads per grid step: largest divisor of H whose resident VMEM footprint
    (score tiles + double-buffered blocks + resident mask + temporaries) fits
    the budget, whose [L, G*D] slab is layout-legal (G == H or G*D % 128 == 0),
    and - when possible - that keeps >= 2 grid steps for v7x's 2 TensorCores."""
    legal = [g for g in range(1, H + 1)
             if H % g == 0 and (g == H or (g * D) % 128 == 0)]

    lane_pad = ((D + 127) // 128 * 128) / D      # VMEM lane padding of [..., D] tiles

    def vmem_estimate(g):
        scores = 3 * g * L * L * 4                                # s, e, p live at once
        if n_inputs == 3:                                         # [1,G,L,D] q/k/v blocks
            inputs = 3 * 2 * g * L * D * in_itemsize * lane_pad   # double-buffered
        else:                                                     # lane-dense [1,L,G*D]
            inputs = 2 * L * g * D * in_itemsize
        outputs = 2 * L * g * D * out_itemsize                    # double-buffered slab
        resident = L * L * 4 + 2 * L * 4                          # att_mask + pad bias
        interm = 2 * g * L * D * 4 * lane_pad                     # f32 [G,L,D] temporaries
        return scores + inputs + outputs + resident + interm

    fitting = [g for g in sorted(legal, reverse=True) if vmem_estimate(g) <= budget]
    multi = [g for g in fitting if B * (H // g) >= 2]   # keep both v7x cores busy
    if multi:
        return multi[0]
    if fitting:
        return fitting[0]
    # TODO(synk): flash-style KV tiling for very long L instead of the full
    # [G, L, L] score tile; until then fall back to the smallest legal group.
    return min(legal)


# ----------------------------------------------------------------------------
# In-kernel building blocks.
# ----------------------------------------------------------------------------
def _split_heads_lanes(x, G, D):
    # [L, G*D] -> [G, L, D]: head g occupies lanes [g*D, (g+1)*D).
    # Static lane-slices + stack: the 'l(gd) -> gld' relayout, robust lowering.
    return jnp.stack([x[:, g * D:(g + 1) * D] for g in range(G)], axis=0)


def _merge_heads_lanes(o, G, D):
    # [G, L, D] -> [L, G*D] lane-dense slab ('gld -> l(gd)'); the caller then
    # issues a single full-width (unmasked) store instead of G masked stores.
    return jnp.concatenate([o[g] for g in range(G)], axis=-1)


def _sdpa(q, k, v, bias):
    """q, k, v: [G, L, D] in the compute dtype (bf16); bias: additive [L, L] f32.
    Returns [G, L, D] f32."""
    # QK^T contracting over D with heads as the batch dim (MXU, bf16 in / f32 acc).
    s = jnp.einsum("gqd,gkd->gqk", q, k, preferred_element_type=jnp.float32)
    s = s + bias                                   # fused att_mask + pad bias
    # numerically-stable softmax; reciprocal on the EUP instead of a VPU divide.
    m = jnp.max(s, axis=-1, keepdims=True)
    e = jnp.exp(s - m)
    denom = jnp.sum(e, axis=-1, keepdims=True)
    p = (e * pl.reciprocal(denom, approx=True)).astype(q.dtype)
    # P @ V, batched over heads (MXU, f32 accumulation).
    return jnp.einsum("gqk,gkd->gqd", p, v, preferred_element_type=jnp.float32)


# ----------------------------------------------------------------------------
# Pallas kernels.
# ----------------------------------------------------------------------------
def _attn_kernel(q_ref, k_ref, v_ref, am_ref, pb_ref, o_ref, *,
                 scale, G, L, D, compute_dtype):
    # q/k/v refs: [1, G, L, D]; am: [L, L]; pb: [1, 1, L]; o: [1, L, G*D]
    q = (q_ref[0] * scale).astype(compute_dtype)   # scale folded into q (L*D work)
    k = k_ref[0].astype(compute_dtype)
    v = v_ref[0].astype(compute_dtype)
    bias = am_ref[...] + pb_ref[0]                 # [L, L] + [1, L] -> [L, L]
    o = _sdpa(q, k, v, bias)                       # [G, L, D] f32
    o_ref[0] = _merge_heads_lanes(o, G, D).astype(o_ref.dtype)   # one wide store


def _attn_shared_kernel(x_ref, am_ref, pb_ref, o_ref, *,
                        scale, G, L, D, compute_dtype):
    # Shared-QKV variant: a single [1, L, G*D] input ref is reused for q, k, v.
    x = x_ref[0].astype(compute_dtype)             # [L, G*D] (already bf16 on MHA path)
    xh = _split_heads_lanes(x, G, D)               # [G, L, D]
    bias = am_ref[...] + pb_ref[0]
    o = _sdpa(xh * scale, xh, xh, bias)            # [G, L, D] f32
    o_ref[0] = _merge_heads_lanes(o, G, D).astype(o_ref.dtype)


# ----------------------------------------------------------------------------
# pallas_call wrappers.
# ----------------------------------------------------------------------------
def _pad_bias(pad_mask):
    # key-padding mask as an additive bias, [B, 1, L] (no H-fold duplication).
    return jnp.where(pad_mask, jnp.float32(-1e30), jnp.float32(0.0))[:, None, :]


def _attention_core(q, k, v, att_mask, pad_mask, *, compute_dtype=jnp.bfloat16):
    """q, k, v: [B, H, L, D]; att_mask: additive [L, L]; pad_mask: bool [B, L].
    Returns [B, L, H*D] with heads concatenated on the last (lane-dense) axis."""
    B, H, L, D = q.shape
    cap = _vmem_capacity_bytes()
    G = _choose_group(B, H, L, D, in_itemsize=q.dtype.itemsize,
                      out_itemsize=q.dtype.itemsize, n_inputs=3,
                      budget=int(cap * 0.45))
    kern = functools.partial(_attn_kernel, scale=1.0 / math.sqrt(D),
                             G=G, L=L, D=D, compute_dtype=compute_dtype)
    return pl.pallas_call(
        kern,
        out_shape=jax.ShapeDtypeStruct((B, L, H * D), q.dtype),
        grid_spec=pltpu.PrefetchScalarGridSpec(
            num_scalar_prefetch=0,
            grid=(B, H // G),
            in_specs=[
                pl.BlockSpec((1, G, L, D), lambda b, hg: (b, hg, 0, 0)),   # q
                pl.BlockSpec((1, G, L, D), lambda b, hg: (b, hg, 0, 0)),   # k
                pl.BlockSpec((1, G, L, D), lambda b, hg: (b, hg, 0, 0)),   # v
                pl.BlockSpec((L, L), lambda b, hg: (0, 0)),                # att_mask (resident)
                pl.BlockSpec((1, 1, L), lambda b, hg: (b, 0, 0)),          # pad bias per batch
            ],
            out_specs=pl.BlockSpec((1, L, G * D), lambda b, hg: (b, 0, hg)),
        ),
        compiler_params=pltpu.CompilerParams(
            dimension_semantics=("parallel", "parallel"),
            vmem_limit_bytes=int(cap * 0.8)),
    )(q, k, v, att_mask.astype(jnp.float32), _pad_bias(pad_mask))


def _attention_core_shared(x, att_mask, pad_mask, nhead, *,
                           out_dtype=None, compute_dtype=jnp.bfloat16):
    """x: lane-dense [B, L, H*D] (q == k == v, the MHA stacking quirk).
    Returns [B, L, H*D] in out_dtype."""
    B, L, HD = x.shape
    H = nhead
    D = HD // H
    out_dtype = x.dtype if out_dtype is None else out_dtype
    cap = _vmem_capacity_bytes()
    G = _choose_group(B, H, L, D, in_itemsize=x.dtype.itemsize,
                      out_itemsize=jnp.dtype(out_dtype).itemsize, n_inputs=1,
                      budget=int(cap * 0.45))
    kern = functools.partial(_attn_shared_kernel, scale=1.0 / math.sqrt(D),
                             G=G, L=L, D=D, compute_dtype=compute_dtype)
    return pl.pallas_call(
        kern,
        out_shape=jax.ShapeDtypeStruct((B, L, HD), out_dtype),
        grid_spec=pltpu.PrefetchScalarGridSpec(
            num_scalar_prefetch=0,
            grid=(B, H // G),
            in_specs=[
                pl.BlockSpec((1, L, G * D), lambda b, hg: (b, 0, hg)),     # shared qkv
                pl.BlockSpec((L, L), lambda b, hg: (0, 0)),                # att_mask (resident)
                pl.BlockSpec((1, 1, L), lambda b, hg: (b, 0, 0)),          # pad bias per batch
            ],
            out_specs=pl.BlockSpec((1, L, G * D), lambda b, hg: (b, 0, hg)),
        ),
        compiler_params=pltpu.CompilerParams(
            dimension_semantics=("parallel", "parallel"),
            vmem_limit_bytes=int(cap * 0.8)),
    )(x, att_mask.astype(jnp.float32), _pad_bias(pad_mask))


def attention_block(q, k, v, att_mask, pad_mask):
    """Pallas equivalent of Attention_Block.forward; returns [B, H, L, D]."""
    B, H, L, D = q.shape
    out = _attention_core(q, k, v, att_mask, pad_mask)        # [B, L, H*D]
    return out.reshape(B, L, H, D).transpose(0, 2, 1, 3)      # [B, H, L, D]


# ----------------------------------------------------------------------------
# MultiHeadAttention wrapper (linear projections stay as plain XLA GEMMs).
# ----------------------------------------------------------------------------
def init_mha_params(key, ndim):
    ks = jax.random.split(key, 8)
    s = 1.0 / math.sqrt(ndim)

    def lin(kw, kb):
        return (jax.random.normal(kw, (ndim, ndim), jnp.float32) * s,
                jax.random.normal(kb, (ndim,), jnp.float32) * s)

    w_q, b_q = lin(ks[0], ks[1])
    w_k, b_k = lin(ks[2], ks[3])
    w_v, b_v = lin(ks[4], ks[5])
    w_o, b_o = lin(ks[6], ks[7])
    return dict(w_q=w_q, b_q=b_q, w_k=w_k, b_k=b_k, w_v=w_v, b_v=b_v,
                w_out=w_o, b_out=b_o)


def multi_head_attention(params, q, k, v, att_mask, pad_mask, *, nhead):
    """Pallas-backed equivalent of MultiHeadAttention.forward.

    Faithful to the reference: `torch.stack(q, dim=1)` is used for q, k and v
    alike, so the w_k / w_v projections are dead code (skipped) and k / v are
    never read.  The kernel is fed the lane-dense [B, L, H*D] query projection
    directly (no host-side head-split transpose), cast to bf16 in the GEMM
    epilogue so the kernel's MXU path and DMA run at bf16 width.
    """
    # k, v intentionally unused (reference semantics discard their projections).
    qp = (q @ params["w_q"].T + params["b_q"]).astype(jnp.bfloat16)
    att = _attention_core_shared(qp, att_mask, pad_mask, nhead, out_dtype=q.dtype)
    return att @ params["w_out"].T + params["b_out"]


# ----------------------------------------------------------------------------
# Pure-JAX references.
# ----------------------------------------------------------------------------
def _attention_reference(q, k, v, att_mask, pad_mask):
    D = q.shape[-1]
    att = jnp.einsum("bhld,bhmd->bhlm", q, k) / math.sqrt(D)
    att = att + att_mask
    att = jnp.where(pad_mask[:, None, None, :], -jnp.inf, att)
    att = jax.nn.softmax(att, axis=-1)
    return jnp.einsum("bhlm,bhmd->bhld", att, v)


def _mha_reference(params, q, k, v, att_mask, pad_mask, *, nhead):
    B, L, ndim = q.shape
    D = ndim // nhead
    qp = q @ params["w_q"].T + params["b_q"]

    def split_heads(x):
        return x.reshape(B, L, nhead, D).transpose(0, 2, 1, 3)

    qh = split_heads(qp)
    kh, vh = qh, qh                       # same stacking quirk as the module
    att = _attention_reference(qh, kh, vh, att_mask, pad_mask)   # [B, H, L, D]
    att = att.transpose(0, 2, 1, 3).reshape(B, L, ndim)
    return att @ params["w_out"].T + params["b_out"]


if __name__ == "__main__":
    B, H, L, D = 2, 4, 8, 32
    ndim, nhead = H * D, H

    key = jax.random.PRNGKey(0)
    kq, kk, kv, kp, kx = jax.random.split(key, 5)

    # additive causal mask [L, L] (0 on/below diagonal, -1e9 above)
    att_mask = jnp.triu(jnp.ones((L, L), dtype=jnp.float32), k=1) * (-1e9)
    # key padding mask [B, L]: last two key positions of batch 1 are padding
    pad_mask = jnp.zeros((B, L), dtype=bool).at[1, L - 2:].set(True)

    # --- Attention_Block core ([B, H, L, D] layout) ---
    q = jax.random.normal(kq, (B, H, L, D), dtype=jnp.float32)
    k = jax.random.normal(kk, (B, H, L, D), dtype=jnp.float32)
    v = jax.random.normal(kv, (B, H, L, D), dtype=jnp.float32)

    out = jax.block_until_ready(attention_block(q, k, v, att_mask, pad_mask))
    ref = _attention_reference(q, k, v, att_mask, pad_mask)
    assert out.shape == (B, H, L, D)
    # bf16 MXU + approx reciprocal -> slightly looser tolerance than all-f32
    assert jnp.allclose(out, ref, rtol=2e-2, atol=2e-2), \
        float(jnp.max(jnp.abs(out - ref)))

    # --- full MultiHeadAttention forward ---
    params = init_mha_params(kp, ndim)
    xq = jax.random.normal(kx, (B, L, ndim), dtype=jnp.float32)
    xk = xq + 0.1   # distinct inputs; the module's stacking quirk ignores them
    xv = xq - 0.1

    mha_out = jax.block_until_ready(
        multi_head_attention(params, xq, xk, xv, att_mask, pad_mask, nhead=nhead))
    mha_ref = _mha_reference(params, xq, xk, xv, att_mask, pad_mask, nhead=nhead)
    assert mha_out.shape == (B, L, ndim)
    assert jnp.allclose(mha_out, mha_ref, rtol=2e-2, atol=2e-2), \
        float(jnp.max(jnp.abs(mha_out - mha_ref)))

    print("KERNEL_OK")
</pallas_src>

<mosaic_0001>
module attributes {stable_mosaic.version = 11 : i64} {
  func.func @_attn_kernel(%arg0: i32, %arg1: i32, %arg2: memref<1x4x8x32xf32, #tpu.memory_space<vmem>>, %arg3: memref<1x4x8x32xf32, #tpu.memory_space<vmem>>, %arg4: memref<1x4x8x32xf32, #tpu.memory_space<vmem>>, %arg5: memref<8x8xf32, #tpu.memory_space<vmem>>, %arg6: memref<1x1x8xf32, #tpu.memory_space<vmem>>, %arg7: memref<1x8x128xf32, #tpu.memory_space<vmem>>) attributes {dimension_semantics = [#tpu.dimension_semantics<parallel>, #tpu.dimension_semantics<parallel>], iteration_bounds = array<i64: 2, 1>, scalar_prefetch = 0 : i64, scratch_operands = 0 : i64, tpu.core_type = #tpu.core_type<tc>, window_params = [{transform_indices = @transform_0, window_bounds = array<i64: 1, 4, 8, 32>}, {transform_indices = @transform_1, window_bounds = array<i64: 1, 4, 8, 32>}, {transform_indices = @transform_2, window_bounds = array<i64: 1, 4, 8, 32>}, {pipeline_mode = #tpu.pipeline_mode<synchronous>, transform_indices = @transform_3, window_bounds = array<i64: 8, 8>}, {transform_indices = @transform_4, window_bounds = array<i64: 1, 1, 8>}, {transform_indices = @transform_5, window_bounds = array<i64: 1, 8, 128>}]} {
    %c0 = arith.constant 0 : index
    %c0_0 = arith.constant 0 : index
    %c0_1 = arith.constant 0 : index
    %c0_2 = arith.constant 0 : index
    %0 = vector.load %arg2[%c0, %c0_0, %c0_1, %c0_2] : memref<1x4x8x32xf32, #tpu.memory_space<vmem>>, vector<1x4x8x32xf32>
    %1 = vector.shape_cast %0 : vector<1x4x8x32xf32> to vector<4x8x32xf32>
    %cst = arith.constant 0.176776692 : f32
    %2 = vector.broadcast %cst : f32 to vector<4x8x32xf32>
    %3 = arith.mulf %1, %2 : vector<4x8x32xf32>
    %4 = arith.truncf %3 : vector<4x8x32xf32> to vector<4x8x32xbf16>
    %c0_3 = arith.constant 0 : index
    %c0_4 = arith.constant 0 : index
    %c0_5 = arith.constant 0 : index
    %c0_6 = arith.constant 0 : index
    %5 = vector.load %arg3[%c0_3, %c0_4, %c0_5, %c0_6] : memref<1x4x8x32xf32, #tpu.memory_space<vmem>>, vector<1x4x8x32xf32>
    %6 = vector.shape_cast %5 : vector<1x4x8x32xf32> to vector<4x8x32xf32>
    %7 = arith.truncf %6 : vector<4x8x32xf32> to vector<4x8x32xbf16>
    %c0_7 = arith.constant 0 : index
    %c0_8 = arith.constant 0 : index
    %c0_9 = arith.constant 0 : index
    %c0_10 = arith.constant 0 : index
    %8 = vector.load %arg4[%c0_7, %c0_8, %c0_9, %c0_10] : memref<1x4x8x32xf32, #tpu.memory_space<vmem>>, vector<1x4x8x32xf32>
    %9 = vector.shape_cast %8 : vector<1x4x8x32xf32> to vector<4x8x32xf32>
    %10 = arith.truncf %9 : vector<4x8x32xf32> to vector<4x8x32xbf16>
    %c0_11 = arith.constant 0 : index
    %c0_12 = arith.constant 0 : index
    %11 = vector.load %arg5[%c0_11, %c0_12] : memref<8x8xf32, #tpu.memory_space<vmem>>, vector<8x8xf32>
    %c0_13 = arith.constant 0 : index
    %c0_14 = arith.constant 0 : index
    %c0_15 = arith.constant 0 : index
    %12 = vector.load %arg6[%c0_13, %c0_14, %c0_15] : memref<1x1x8xf32, #tpu.memory_space<vmem>>, vector<1x1x8xf32>
    %13 = vector.shape_cast %12 : vector<1x1x8xf32> to vector<1x8xf32>
    %14 = vector.broadcast %13 : vector<1x8xf32> to vector<8x8xf32>
    %15 = arith.addf %11, %14 : vector<8x8xf32>
    "tpu.trace_start"() <{level = 10 : i32, message = "gqd,gkd->gqk"}> : () -> ()
    %cst_16 = arith.constant dense<0.000000e+00> : vector<4x8x8xf32>
    %16 = tpu.matmul %4, %7, %cst_16 {dimension_numbers = #tpu.dot_dimension_numbers<[2], [2], [1], [1], [0, 0, 0, 1, 1, 1], [0], [0]>} : vector<4x8x32xbf16>, vector<4x8x32xbf16>, vector<4x8x8xf32> -> vector<4x8x8xf32>
    "tpu.trace_stop"() : () -> ()
    %17 = vector.shape_cast %15 : vector<8x8xf32> to vector<1x8x8xf32>
    %18 = vector.broadcast %17 : vector<1x8x8xf32> to vector<4x8x8xf32>
    %19 = arith.addf %16, %18 : vector<4x8x8xf32>
    %cst_17 = arith.constant dense<0xFF800000> : vector<4x8xf32>
    %20 = vector.multi_reduction <maximumf>, %19, %cst_17 [2] : vector<4x8x8xf32> to vector<4x8xf32>
    %21 = vector.shape_cast %20 : vector<4x8xf32> to vector<4x8x1xf32>
    %22 = vector.broadcast %21 : vector<4x8x1xf32> to vector<4x8x8xf32>
    %23 = arith.subf %19, %22 : vector<4x8x8xf32>
    %24 = math.exp %23 : vector<4x8x8xf32>
    %cst_18 = arith.constant dense<0.000000e+00> : vector<4x8xf32>
    %25 = vector.multi_reduction <add>, %24, %cst_18 [2] : vector<4x8x8xf32> to vector<4x8xf32>
    %26 = vector.shape_cast %25 : vector<4x8xf32> to vector<4x8x1xf32>
    %27 = tpu.reciprocal %26 {approx = true} : vector<4x8x1xf32> -> vector<4x8x1xf32>
    %28 = vector.broadcast %27 : vector<4x8x1xf32> to vector<4x8x8xf32>
    %29 = arith.mulf %24, %28 : vector<4x8x8xf32>
    %30 = arith.truncf %29 : vector<4x8x8xf32> to vector<4x8x8xbf16>
    "tpu.trace_start"() <{level = 10 : i32, message = "gqk,gkd->gqd"}> : () -> ()
    %cst_19 = arith.constant dense<0.000000e+00> : vector<4x8x32xf32>
    %31 = tpu.matmul %30, %10, %cst_19 {dimension_numbers = #tpu.dot_dimension_numbers<[2], [1], [1], [2], [0, 0, 0, 1, 1, 2], [0], [0]>} : vector<4x8x8xbf16>, vector<4x8x32xbf16>, vector<4x8x32xf32> -> vector<4x8x32xf32>
    "tpu.trace_stop"() : () -> ()
    %32 = vector.extract_strided_slice %31 {offsets = [0, 0, 0], sizes = [1, 8, 32], strides = [1, 1, 1]} : vector<4x8x32xf32> to vector<1x8x32xf32>
    %33 = vector.shape_cast %32 : vector<1x8x32xf32> to vector<8x32xf32>
    %34 = vector.extract_strided_slice %31 {offsets = [1, 0, 0], sizes = [1, 8, 32], strides = [1, 1, 1]} : vector<4x8x32xf32> to vector<1x8x32xf32>
    %35 = vector.shape_cast %34 : vector<1x8x32xf32> to vector<8x32xf32>
    %36 = vector.extract_strided_slice %31 {offsets = [2, 0, 0], sizes = [1, 8, 32], strides = [1, 1, 1]} : vector<4x8x32xf32> to vector<1x8x32xf32>
    %37 = vector.shape_cast %36 : vector<1x8x32xf32> to vector<8x32xf32>
    %38 = vector.extract_strided_slice %31 {offsets = [3, 0, 0], sizes = [1, 8, 32], strides = [1, 1, 1]} : vector<4x8x32xf32> to vector<1x8x32xf32>
    %39 = vector.shape_cast %38 : vector<1x8x32xf32> to vector<8x32xf32>
    %40 = tpu.concatenate %33, %35, %37, %39 in 1 : vector<8x32xf32>, vector<8x32xf32>, vector<8x32xf32>, vector<8x32xf32> -> vector<8x128xf32>
    %c0_20 = arith.constant 0 : index
    %c0_21 = arith.constant 0 : index
    %c0_22 = arith.constant 0 : index
    %41 = vector.load %arg7[%c0_20, %c0_21, %c0_22] : memref<1x8x128xf32, #tpu.memory_space<vmem>>, vector<1x8x128xf32>
    %42 = vector.shape_cast %41 : vector<1x8x128xf32> to vector<8x128xf32>
    %43 = vector.shape_cast %40 : vector<8x128xf32> to vector<1x8x128xf32>
    tpu.vector_store %arg7[%c0_20, %c0_21, %c0_22], %43 {strides = array<i32>} : memref<1x8x128xf32, #tpu.memory_space<vmem>>, vector<1x8x128xf32>,
    return
  }
  func.func @transform_0(%arg0: i32, %arg1: i32) -> (i32, i32, i32, i32) {
    %c0_i32 = arith.constant 0 : i32
    %c0_i32_0 = arith.constant 0 : i32
    %c0_i32_1 = arith.constant 0 : i32
    return %arg0, %arg1, %c0_i32, %c0_i32_0 : i32, i32, i32, i32
  }
  func.func @transform_1(%arg0: i32, %arg1: i32) -> (i32, i32, i32, i32) {
    %c0_i32 = arith.constant 0 : i32
    %c0_i32_0 = arith.constant 0 : i32
    %c0_i32_1 = arith.constant 0 : i32
    return %arg0, %arg1, %c0_i32, %c0_i32_0 : i32, i32, i32, i32
  }
  func.func @transform_2(%arg0: i32, %arg1: i32) -> (i32, i32, i32, i32) {
    %c0_i32 = arith.constant 0 : i32
    %c0_i32_0 = arith.constant 0 : i32
    %c0_i32_1 = arith.constant 0 : i32
    return %arg0, %arg1, %c0_i32, %c0_i32_0 : i32, i32, i32, i32
  }
  func.func @transform_3(%arg0: i32, %arg1: i32) -> (i32, i32) {
    %c0_i32 = arith.constant 0 : i32
    %c0_i32_0 = arith.constant 0 : i32
    %c0_i32_1 = arith.constant 0 : i32
    return %c0_i32, %c0_i32_0 : i32, i32
  }
  func.func @transform_4(%arg0: i32, %arg1: i32) -> (i32, i32, i32) {
    %c0_i32 = arith.constant 0 : i32
    %c0_i32_0 = arith.constant 0 : i32
    %c0_i32_1 = arith.constant 0 : i32
    return %arg0, %c0_i32, %c0_i32_0 : i32, i32, i32
  }
  func.func @transform_5(%arg0: i32, %arg1: i32) -> (i32, i32, i32) {
    %c0_i32 = arith.constant 0 : i32
    %c0_i32_0 = arith.constant 0 : i32
    return %arg0, %c0_i32, %arg1 : i32, i32, i32
  }
}

</mosaic_0001>

<bundles_post_ra>
// kernel: tpu_custom_call.1
= control target key start
LH: loop header
LB: loop body
LE: loop exit
PB: predicated region body
PF: predicated region fallthrough
CT: control target
= control target key end

     0   :  { %s1757_s0 = inlined_call_operand.hbm [shape: f32[2,4,8,32], index: 0, kind: input, shape index: {}]   ;;  %s1758_s1 = inlined_call_operand.hbm [shape: f32[2,4,8,32], index: 1, kind: input, shape index: {}]   ;;  %s1759_s2 = inlined_call_operand.hbm [shape: f32[2,4,8,32], index: 2, kind: input, shape index: {}]   ;;  %s1760_s3 = inlined_call_operand.hbm [shape: f32[8,8], index: 3, kind: input, shape index: {}]   ;;  %s1761_s4 = inlined_call_operand.vmem [shape: f32[2,1,8], index: 4, kind: input, shape index: {}]   ;;  %s1762_s5 = inlined_call_operand.hbm [shape: f32[2,8,128], index: 5, kind: output, shape index: {}]  }
   0x1   :  { %1772 = sst [smem:[#allocation18_spill]] %s1757_s0 }
   0x2   :  { %1773 = sst [smem:[#allocation19_spill]] %s1758_s1 }
   0x3   :  { %10 = vsyncpa [#allocation3], 0 }
   0x4   :  { %12 = vsyncpa [#allocation3 + $0x1], 0 }
   0x5   :  { %13 = vsyncpa [#allocation6], 0 }
   0x6   :  { %15 = vsyncpa [#allocation6 + $0x1], 0 }
   0x7   :  { %16 = vsyncpa [#allocation9], 0 }
   0x8   :  { %17 = vsyncpa [#allocation4], 0 }
   0x9   :  { %19 = vsyncpa [#allocation4 + $0x1], 0  ;;  %s1464_s18 = smov 0   ;;  %s1466_s19 = smov 0  }
   0xa   :  { %s1468_s20 = smov 0   ;;  %s1470_s21 = smov 0  }
   0xb   :  { %s1472_s22 = smov 0   ;;  %s1474_s23 = smov 0  }
   0xc LB: > { %1774 = sst [smem:[#allocation15_spill]] %s1416_s22  ;;  %s37_s24 = sadd.s32 1, %s1416_s22  ;;  %s1420_s23 = sphi %s1474_s23, %s25_s23   ;;  %s1416_s22 = sphi %s1472_s22, %s1795_s22   ;;  %s1412_s21 = sphi %s1470_s21, %s1794_s21   ;;  %s1408_s20 = sphi %s1468_s20, %s1798_s20   ;;  %s1404_s19 = sphi %s1466_s19, %s1797_s19   ;;  %s1400_s18 = sphi %s1464_s18, %s1796_s18  }
   0xd   : > { %s46_s25 = sadd.s32 1, %s1408_s20  ;;  %p39_p0 = scmp.ge.s32.totalorder %s37_s24, 2 }
   0xe   : > { %p53_p1 = scmp.ne.s32.totalorder %s1408_s20, %s1404_s19  ;;  %p54_p2 = scmp.eq.s32.totalorder %s1420_s23, 0 }
   0xf   : > { %s1800_s24 = smov (%p39_p0, %s37_s24), 0  ;;  %p1147_p5 = scmp.lt.s32.totalorder %s1420_s23, 2 }
  0x10   : > { %1775 = sst [smem:[#allocation16_spill]] %s1800_s24  ;;  %p55_p4 = por %p54_p2, %p53_p1 }
  0x11   : > { %s41_s26 = ssub.s32 %s1416_s22, %s1800_s24  ;;  %s1767_s27 = sand.u32 1, %s1408_s20  }
  0x12   : > { %p44_p6 = scmp.eq.s32.totalorder %s41_s26, 0  ;;  %s1511_s28 = sshll.u32 %s1767_s27, 5 }
  0x13   : > { %s1514_s29 = sshll.u32 %s1416_s22, 9  ;;  %p1516_p7 = pnand %p1147_p5, %p55_p4 }
  0x14   : > { %s1521_s6 = scalar_select %p44_p6, %s1408_s20, %s46_s25  }
  0x15   : > { %s248_s7 = sand.u32 1, %s1420_s23   ;;  %s1778_s1 = sld [smem:[#allocation19_spill]] }
  0x16   : > { %1777 = sst [smem:[#allocation17_spill]] %s1521_s6  ;;  %s252_s11 = scalar_lea.vmem [#allocation5], %s1511_s28 }
  0x17   : > { %s261_s12 = sshll.u32 %s252_s11, 4  ;;  %s1529_s13 = scalar_lea.sflag [#allocation6], %s248_s7  ;;  %s262_s12 = int_to_ptr.vmem [resolvable:$true] %s261_s12 }
  0x18   : > { %p1771_p8 = pneg %p1516_p7  ;;  %s1235_s14 = scalar_lea.vmem %s262_s12, 512 }
  0x19   : > { %p1236_p9 = scmp.ne.s32.totalorder %s262_s12, %s1235_s14  ;;  %s1422_s15 = smov [#allocation5]  }
  0x1a   : > { %s1240_s16 = sshll.u32 %s1422_s15, 4  ;;  %s1241_s16 = int_to_ptr.vmem [resolvable:$false] %s1240_s16 }
  0x1b   : > { %s260_s10 = scalar_lea.hbm %s1778_s1, %s1514_s29  ;;  %p1238_p10 = pnand %p1236_p9, %p1771_p8 }
  0x1c   : > { %s1242_s17 = scalar_lea.vmem %s1241_s16, 1024  ;;  %p1243_p12 = scmp.lt.s32.totalorder %s262_s12, %s1241_s16 }
  0x1d   : > { %p1239_p11 = pneg %p1238_p10  ;;  %p1244_p13 = scmp.lt.s32.totalorder %s1242_s17, %s1235_s14 }
  0x1f   : > { %p1245_p0 = por %p1244_p13, %p1243_p12 }
  0x21   : > { %p1246_p2 = pnand %p1245_p0, %p1239_p11 }
  0x23   : > { %1249 = shalt.err (!%p1246_p2)
}
  0x24   : > { %s1763_s25 = smov 128   ;;  %s1765_s26 = smov 8  }
  0x25   : > { %1138 = dma.hbm_to_vmem [thread:$0]  (!%p1516_p7), %s260_s10, 512, %s262_s12, %s1529_s13, %s1763_s25, %s1763_s25, %s1765_s26  }
  0x26   : > { %s1543_s7 = sadd.s32 4294967295, %s1420_s23   ;;  %s1017_s8 = sadd.s32 4294967294, %s1420_s23  }
  0x27   : > { %p59_p4 = scmp.ne.s32.totalorder %s1404_s19, %s1400_s18  ;;  %p1770_p5 = scmp.eq.s32.totalorder %s1543_s7, 0 }
  0x28   : > { %p188_p6 = scmp.eq.s32.totalorder %s1543_s7, 1  ;;  %p194_p9 = scmp.eq.s32.totalorder %s1017_s8, 1 }
  0x29   : > { %p1018_p10 = scmp.ge.s32.totalorder %s1420_s23, 1  ;;  %p1553_p11 = por %p1770_p5, %p59_p4 }
  0x2a   : > { %p1560_p12 = por %p188_p6, %p53_p1  ;;  %p1564_p13 = por %p194_p9, %p59_p4 }
  0x2b   : > { %p201_p0 = scmp.lt.s32.totalorder %s1420_s23, 3  ;;  %s1425_s14 = smov [#allocation8]  }
  0x2c   : > { %s1781_s11 = scalar_select %p1564_p13, 1, 0 }
  0x2d   : > { %p1569_p2 = pnand %p1018_p10, %p201_p0  ;;  %s214_s15 = sshll.u32 %s1425_s14, 4  ;;  %s1573_s15 = int_to_ptr.vmem [resolvable:$true] %s214_s15 }
  0x2e   : > { %s1783_s0 = sld [smem:[#allocation18_spill]]  ;;  %s229_s25 = scalar_lea.vmem [#allocation2], %s1511_s28 }
  0x2f   : > { %p1128_p1 = pneg %p1569_p2  ;;  %s238_s26 = sshll.u32 %s229_s25, 4  ;;  %s239_s26 = int_to_ptr.vmem [resolvable:$true] %s238_s26 }
  0x30   : > { %s1785_s1 = sand.u32 1, %s1408_s20   ;;  %s1263_s22 = scalar_lea.vmem %s239_s26, 512 }
  0x31   : > { %p1584_p4 = pnand %p1128_p1, %p1770_p5  ;;  %s226_s24 = scalar_lea.sflag [#allocation3], %s1785_s1 }
  0x32   : > { %p1264_p6 = scmp.ne.s32.totalorder %s239_s26, %s1263_s22  ;;  %s1426_s14 = smov [#allocation2]  }
  0x33   : > { %s1268_s6 = sshll.u32 %s1426_s14, 4  ;;  %s1269_s6 = int_to_ptr.vmem [resolvable:$false] %s1268_s6 }
  0x34   : > { %s237_s8 = scalar_lea.hbm %s1783_s0, %s1514_s29  ;;  %p1266_p9 = pnand %p1264_p6, %p1771_p8 }
  0x35   : > { %s1270_s16 = scalar_lea.vmem %s1269_s6, 1024  ;;  %p1271_p0 = scmp.lt.s32.totalorder %s239_s26, %s1269_s6 }
  0x36   : > { %p1267_p10 = pneg %p1266_p9  ;;  %p1272_p3 = scmp.lt.s32.totalorder %s1270_s16, %s1263_s22 }
  0x38   : > { %p1273_p13 = por %p1272_p3, %p1271_p0 }
  0x3a   : > { %p1274_p1 = pnand %p1273_p13, %p1267_p10 }
  0x3c   : > { %1277 = shalt.err (!%p1274_p1)
}
  0x3d   : > { %s1786_s25 = smov 8   ;;  %s1787_s17 = smov 128  }
  0x3e   : > { %1135 = dma.hbm_to_vmem [thread:$0]  (!%p1516_p7), %s237_s8, 512, %s239_s26, %s226_s24, %s1787_s17, %s1787_s17, %s1786_s25  }
  0x3f   : > { %p1280_p6 = pneg %p1584_p4  ;;  %s1289_s1 = scalar_lea.vmem %s1573_s15, 128 }
  0x40   : > { %p1290_p9 = scmp.ne.s32.totalorder %s1573_s15, %s1289_s1  ;;  %p1297_p3 = scmp.lt.s32.totalorder %s1573_s15, %s1573_s15 }
  0x41   : > { %p1298_p13 = scmp.lt.s32.totalorder %s1289_s1, %s1289_s1 }
  0x42   : > { %p1292_p5 = pnand %p1290_p9, %p1280_p6 }
  0x43   : > { %p1299_p10 = por %p1298_p13, %p1297_p3 }
  0x44   : > { %p1293_p8 = pneg %p1292_p5 }
  0x46   : > { %p1300_p0 = pnand %p1299_p10, %p1293_p8 }
  0x48   : > { %1303 = shalt.err (!%p1300_p0)
}
  0x49   : > { %1131 = dma.hbm_to_vmem [thread:$0]  (!%p1584_p4), %s1760_s3, 128, %s1573_s15, [#allocation9]  }
  0x4a   : > { %s283_s8 = scalar_lea.hbm %s1759_s2, %s1514_s29  ;;  %s275_s14 = scalar_lea.vmem [#allocation7], %s1511_s28 }
  0x4b   : > { %s284_s16 = sshll.u32 %s275_s14, 4  ;;  %p1788_p5 = pneg %p1516_p7  ;;  %s285_s16 = int_to_ptr.vmem [resolvable:$true] %s284_s16 }
  0x4c   : > { %s1317_s1 = scalar_lea.vmem %s285_s16, 512  ;;  %s1427_s27 = smov [#allocation7]  }
  0x4d   : > { %p1318_p8 = scmp.ne.s32.totalorder %s285_s16, %s1317_s1  ;;  %s1322_s0 = sshll.u32 %s1427_s27, 4  ;;  %s1323_s0 = int_to_ptr.vmem [resolvable:$false] %s1322_s0 }
  0x4e   : > { %s1324_s22 = scalar_lea.vmem %s1323_s0, 1024  ;;  %p1325_p9 = scmp.lt.s32.totalorder %s285_s16, %s1323_s0 }
  0x4f   : > { %p1320_p1 = pnand %p1318_p8, %p1788_p5  ;;  %p1326_p3 = scmp.lt.s32.totalorder %s1324_s22, %s1317_s1 }
  0x51   : > { %p1321_p6 = pneg %p1320_p1  ;;  %p1327_p4 = por %p1326_p3, %p1325_p9 }
  0x53   : > { %p1328_p13 = pnand %p1327_p4, %p1321_p6 }
  0x55   : > { %1331 = shalt.err (!%p1328_p13)
}
  0x56   : > { %1141 = dma.hbm_to_vmem [thread:$0]  (!%p1516_p7), %s283_s8, 512, %s285_s16, %s1529_s13, %s1787_s17, %s1787_s17, %s1786_s25  }
  0x57   : > { %302 = sbr.rel (%p1569_p2) target bundleno = 953 (0x3b9), region = 40  ;;  %s1627_s28 = sand.u32 (!%p1569_p2), 1, %s1404_s19  }
  0x58   : > { %s1031_s0 = sshll.u32 (!%p1569_p2), %s1627_s28, 5  ;;  %s305_s29 = scalar_lea.sflag (!%p1569_p2), [#allocation3], %s1627_s28 }
  0x59   : > { %s1631_s15 = scalar_lea.vmem (!%p1569_p2), [#allocation2], %s1031_s0 }
  0x5c   : > { %1383 = dma.done.wait (%p1553_p11), %s305_s29, 512  }
  0x5d   : > { %1385 = vsyncadd (%p1553_p11), %s305_s29, 4294966784  ;;  %s313_s30 = sand.u32 1, %s1543_s7   ;;  %s317_s12 = scalar_lea.vmem [#allocation5], %s1031_s0 }
  0x5e   : > { %s314_s13 = scalar_lea.sflag [#allocation6], %s313_s30 }
  0x5f   : > { %1387 = dma.done.wait (%p1553_p11), %s314_s13, 1024  }
  0x60   : > { %1389 = vsyncadd (%p1553_p11), %s314_s13, 4294966272  ;;  %s1642_s25 = scalar_lea.vmem [#allocation7], %s1031_s0  ;;  %p1789_p7 = scmp.eq.s32.totalorder %s1543_s7, 0 }
  0x62   : > { %1391 = dma.done.wait (%p1789_p7), [#allocation9], 128   ;;  %p1790_p2 = pmov %p1789_p7 }
  0x63   : > { %v1428_v0 = vmov 0.0   ;;  %vm1429_vm0 = vmmov 0   ;;  %v389_v1 = vld [vmem:[%s317_s12] sm:$0xff]  ;;  %vm414_vm1 = vcmask 261120   ;;  %v390_v2 = vld [vmem:[%s317_s12 + $0x8] sm:$0xff]  ;;  %v391_v7 = vld [vmem:[%s317_s12 + $0x10] sm:$0xff] }
  0x64   : > { %1393 = vsyncadd (%p1790_p2), [#allocation9], 4294967168  ;;  %1068 = vmatprep.subr.bf16.mxu0 %v1428_v0  ;;  %1074 = vmatprep.subr.bf16.mxu1 %v1428_v0  ;;  %v377_v3 = vld [vmem:[%s1631_s15] sm:$0xff]  ;;  %v393_v4 = vpack.c.bf16 %v389_v1, %v389_v1  ;;  %v394_v5 = vpack.c.bf16 %v390_v2, %v390_v2  ;;  %v378_v6 = vld [vmem:[%s1631_s15 + $0x8] sm:$0xff]  ;;  %v395_v13 = vpack.c.bf16 %v391_v7, %v391_v7  ;;  %p373_p11 = scmp.lt.s32.totalorder %s1412_s21, 1  ;;  %vm599_vm2 = vcmask 64512  }
  0x65   : > { %1070 = vmatprep.mubr.msk.bf16.mxu0 %vm1429_vm0, %v1428_v0  ;;  %1076 = vmatprep.mubr.msk.bf16.mxu1 %vm1429_vm0, %v1428_v0  ;;  %v392_v8 = vld [vmem:[%s317_s12 + $0x18] sm:$0xff]  ;;  %v381_v11 = vmul.f32 0.17677669, %v377_v3  ;;  %v382_v12 = vmul.f32 0.17677669, %v378_v6  ;;  %v379_v17 = vld [vmem:[%s1631_s15 + $0x10] sm:$0xff] }
  0x66   : > { %v419_v9 = vsel %vm414_vm1, %v393_v4, 0  ;;  %v465_v10 = vsel %vm414_vm1, %v394_v5, 0  ;;  %v396_v14 = vpack.c.bf16 %v392_v8, %v392_v8  ;;  %v380_v18 = vld [vmem:[%s1631_s15 + $0x18] sm:$0xff]  ;;  %v511_v19 = vsel %vm414_vm1, %v395_v13, 0  ;;  %s374_s7 = scalar_select %p373_p11, %s1412_s21, 1  ;;  %v405_v25 = vld [vmem:[#allocation8] sm:$0xff] }
  0x67   : > { %1069 = vmatpush3.bf16.xpose.msra.mxu0 %v419_v9  ;;  %1075 = vmatpush3.bf16.xpose.msra.mxu1 %v465_v10  ;;  %v385_v15 = vpack.c.bf16 %v381_v11, %v381_v11  ;;  %v386_v16 = vpack.c.bf16 %v382_v12, %v382_v12  ;;  %v383_v21 = vmul.f32 0.17677669, %v379_v17  ;;  %v384_v22 = vmul.f32 0.17677669, %v380_v18  ;;  %v397_v9 = vld [vmem:[%s1642_s25] sm:$0xff]  ;;  %v398_v12 = vld [vmem:[%s1642_s25 + $0x8] sm:$0xff] }
  0x68   : > { %1080 = vmatprep.subr.bf16.mxu0 %v1428_v0  ;;  %1086 = vmatprep.subr.bf16.mxu1 %v1428_v0  ;;  %v557_v20 = vsel %vm414_vm1, %v396_v14, 0  ;;  %s375_s6 = scalar_lea.vmem %s1761_s4, %s374_s7  ;;  %vm651_vm3 = vcmask 1043456   ;;  %v401_v10 = vpack.c.bf16 %v397_v9, %v397_v9  ;;  %v402_v13 = vpack.c.bf16 %v398_v12, %v398_v12  ;;  %v399_v18 = vld [vmem:[%s1642_s25 + $0x10] sm:$0xff]  ;;  %s1430_s24 = smov 32  }
  0x69   : > { %v387_v23 = vpack.c.bf16 %v383_v21, %v383_v21  ;;  %v388_v24 = vpack.c.bf16 %v384_v22, %v384_v22  ;;  %v1036_v26 = vld [vmem:[%s375_s6] ss:$0 sm:$0xff]  ;;  %v400_v22 = vld [vmem:[%s1642_s25 + $0x18] sm:$0xff]  ;;  %s1431_s26 = smov 64   ;;  %s1432_s8 = smov 96   ;;  %vm846_vm4 = vcmask 523264  }
  0x6a   : > { %v413_v27 = vadd.f32 %v1036_v26, %v405_v25  ;;  %v653_v11 = vsel %vm651_vm3, %v401_v10, 0  ;;  %v699_v14 = vsel %vm651_vm3, %v402_v13, 0  ;;  %v404_v26 = vpack.c.bf16 %v400_v22, %v400_v22  ;;  %s1035_s14 = sshll.u32 %s1627_s28, 3  ;;  %s1046_s16 = sshll.u32 %s1412_s21, 7 }
  0x6b   : > { %s369_s1 = scalar_lea.vmem [#allocation10], %s1035_s14  ;;  %vm848_vm5 = vcmask 785408   ;;  %s1715_s29 = scalar_lea.hbm %s1762_s5, %s1046_s16 }
  0x6c   : > { %s866_s27 = sshll.u32 %s369_s1, 4  ;;  %s852_s15 = scalar_lea.sflag [#allocation4], %s1627_s28  ;;  %s867_s27 = int_to_ptr.vmem [resolvable:$true] %s866_s27 }
  0x6d   : > { %s1332_s30 = scalar_lea.vmem %s867_s27, 128  ;;  %s1433_s21 = smov [#allocation10]  }
  0x6e   : > { %1071 = vmatmul.mubr.msk.bf16.vlgmr.msra.gmra.mxu0 %vm414_vm1, %v385_v15  ;;  %1077 = vmatmul.mubr.msk.bf16.vlgmr.msra.gmra.mxu1 %vm414_vm1, %v386_v16  ;;  %p1333_p10 = scmp.ne.s32.totalorder %s867_s27, %s1332_s30  ;;  %s1336_s13 = sshll.u32 %s1433_s21, 4  ;;  %s1337_s13 = int_to_ptr.vmem [resolvable:$false] %s1336_s13 }
  0x6f   : > { %1081 = vmatpush3.bf16.xpose.msra.mxu0 %v511_v19  ;;  %1087 = vmatpush3.bf16.xpose.msra.mxu1 %v557_v20  ;;  %v403_v20 = vpack.c.bf16 %v399_v18, %v399_v18  ;;  %s1338_s12 = scalar_lea.vmem %s1337_s13, 256  ;;  %p1339_p5 = scmp.lt.s32.totalorder %s867_s27, %s1337_s13 }
  0x70   : > { %1082 = vmatprep.mubr.msk.bf16.mxu0 %vm1429_vm0, %v1428_v0  ;;  %1088 = vmatprep.mubr.msk.bf16.mxu1 %vm1429_vm0, %v1428_v0  ;;  %p1334_p0 = pnand %p1333_p10, %p1560_p12  ;;  %p1340_p1 = scmp.lt.s32.totalorder %s1338_s12, %s1332_s30 }
  0x71   : > { %1092 = vmatprep.subr.bf16.mxu0 %v1428_v0  ;;  %1098 = vmatprep.subr.bf16.mxu1 %v1428_v0  ;;  %v745_v25 = vsel %vm651_vm3, %v403_v20, 0 }
  0x72   : > { %p1335_p8 = pneg %p1334_p0  ;;  %p1341_p6 = por %p1340_p1, %p1339_p5 }
  0x74   : > { %p1342_p9 = pnand %p1341_p6, %p1335_p8 }
  0x76   : > { %1083 = vmatmul.mubr.msk.bf16.vlgmr.msra.gmra.mxu0 %vm414_vm1, %v387_v23  ;;  %1089 = vmatmul.mubr.msk.bf16.vlgmr.msra.gmra.mxu1 %vm414_vm1, %v388_v24 }
  0x77   : > { %1094 = vmatprep.mubr.msk.bf16.mxu0 %vm1429_vm0, %v1428_v0  ;;  %1100 = vmatprep.mubr.msk.bf16.mxu1 %vm1429_vm0, %v1428_v0 }
  0x78   : > { %1093 = vmatpush3.bf16.msra.mxu0 %v653_v11  ;;  %1099 = vmatpush3.bf16.msra.mxu1 %v699_v14 }
  0x79   : > { %1104 = vmatprep.subr.bf16.mxu0 %v1428_v0  ;;  %1110 = vmatprep.subr.bf16.mxu1 %v1428_v0 }
 0x12e   : > { %v455_v28 = vpop.f32.mrf.mxu0  ;;  %v501_v29 = vpop.f32.mrf.mxu1 }
 0x12f   : > { %v456_v30 = vadd.f32 %v455_v28, %v413_v27  ;;  %v502_v31 = vadd.f32 %v501_v29, %v413_v27 }
 0x130   : > { %v1072_v32 = vpop.f32.mrf.mxu0  ;;  %v1078_v33 = vpop.f32.mrf.mxu1 }
 0x131   : > { %v600_v34 = vsel %vm599_vm2, %v456_v30, -inf  ;;  %v603_v37 = vsel %vm599_vm2, %v502_v31, -inf }
 0x132   : > { %v504_v35 = vpop.f32.mrf.mxu1  ;;  %601 = vmax.xlane.f32.xlu0 %v600_v34  ;;  %v458_v36 = vpop.f32.mrf.mxu0 }
 0x134   : > { %v1073_v38 = vpop.f32.mrf.mxu0  ;;  %v1079_v39 = vpop.f32.mrf.mxu1 }
 0x136   : > { %v593_v40 = vpop.f32.mrf.mxu1  ;;  %604 = vmax.xlane.f32.xlu0 %v603_v37  ;;  %v547_v41 = vpop.f32.mrf.mxu0 }
 0x137   : > { %v594_v42 = vadd.f32 %v593_v40, %v413_v27  ;;  %v548_v43 = vadd.f32 %v547_v41, %v413_v27 }
 0x138   : > { %v1084_v44 = vpop.f32.mrf.mxu0  ;;  %v1090_v45 = vpop.f32.mrf.mxu1 }
 0x139   : > { %v606_v46 = vsel %vm599_vm2, %v548_v43, -inf  ;;  %v609_v49 = vsel %vm599_vm2, %v594_v42, -inf }
 0x13a   : > { %v596_v47 = vpop.f32.mrf.mxu1  ;;  %607 = vmax.xlane.f32.xlu1 %v606_v46  ;;  %v550_v48 = vpop.f32.mrf.mxu0 }
 0x13c   : > { %v1085_v50 = vpop.f32.mrf.mxu0  ;;  %v1091_v51 = vpop.f32.mrf.mxu1 }
 0x13e   : > { %610 = vmax.xlane.f32.xlu1 %v609_v49 }
 0x1bb   : > { %v602_v52 = vpop.xlane.xlu0 %601 }
 0x1bc   : > { %v612_v53 = vsub.f32 %v456_v30, %v602_v52  ;;  %v791_v30 = vsel %vm651_vm3, %v404_v26, 0 }
 0x1be   : > { %v616_v54 = vmul.f32 1.442695, %v612_v53 }
 0x1bf   : > { %v605_v55 = vpop.xlane.xlu0 %604 }
 0x1c0   : > { %1206 = vpow2.f32 %v616_v54  ;;  %v613_v56 = vsub.f32 %v502_v31, %v605_v55 }
 0x1c2   : > { %v618_v57 = vmul.f32 1.442695, %v613_v56 }
 0x1c3   : > { %v608_v58 = vpop.xlane.xlu1 %607 }
 0x1c4   : > { %1208 = vpow2.f32 %v618_v57  ;;  %v614_v59 = vsub.f32 %v548_v43, %v608_v58 }
 0x1c6   : > { %v620_v60 = vmul.f32 1.442695, %v614_v59 }
 0x1c7   : > { %v611_v61 = vpop.xlane.xlu1 %610 }
 0x1c8   : > { %1210 = vpow2.f32 %v620_v60  ;;  %v615_v62 = vsub.f32 %v594_v42, %v611_v61 }
 0x1ca   : > { %v622_v63 = vmul.f32 1.442695, %v615_v62 }
 0x1cc   : > { %1212 = vpow2.f32 %v622_v63 }
 0x1cd   : > { %v1207_v1 = vpop.eup %1206 }
 0x1ce   : > { %v624_v2 = vsel %vm599_vm2, %v1207_v1, 0.0 }
 0x1cf   : > { %625 = vadd.xlane.f32.xlu0 %v624_v2 }
 0x1d1   : > { %v1209_v3 = vpop.eup %1208 }
 0x1d2   : > { %v627_v4 = vsel %vm599_vm2, %v1209_v3, 0.0 }
 0x1d3   : > { %628 = vadd.xlane.f32.xlu1 %v627_v4 }
 0x1d5   : > { %v1211_v5 = vpop.eup %1210 }
 0x1d6   : > { %v630_v6 = vsel %vm599_vm2, %v1211_v5, 0.0 }
 0x1d7   : > { %631 = vadd.xlane.f32.xlu0 %v630_v6 }
 0x1d9   : > { %v1213_v7 = vpop.eup %1212 }
 0x1da   : > { %v633_v8 = vsel %vm599_vm2, %v1213_v7, 0.0 }
 0x1db   : > { %634 = vadd.xlane.f32.xlu1 %v633_v8 }
 0x258   : > { %v626_v15 = vpop.xlane.xlu0 %625 }
 0x259   : > { %1214 = vrcp.f32 %v626_v15 }
 0x25c   : > { %v629_v16 = vpop.xlane.xlu1 %628 }
 0x25d   : > { %1216 = vrcp.f32 %v629_v16 }
 0x260   : > { %v632_v17 = vpop.xlane.xlu0 %631 }
 0x261   : > { %1218 = vrcp.f32 %v632_v17 }
 0x264   : > { %v635_v19 = vpop.xlane.xlu1 %634 }
 0x265   : > { %1220 = vrcp.f32 %v635_v19 }
 0x266   : > { %v1215_v21 = vpop.eup %1214 }
 0x267   : > { %v640_v23 = vmul.f32 %v1215_v21, %v1207_v1 }
 0x269   : > { %v644_v24 = vpack.c.bf16 %v640_v23, %v640_v23 }
 0x26a   : > { %v1217_v27 = vpop.eup %1216 }
 0x26b   : > { %1095 = vmatmul.mubr.msk.bf16.vlgmr.msra.gmra.mxu0 %vm599_vm2, %v644_v24  ;;  %v641_v28 = vmul.f32 %v1217_v27, %v1209_v3 }
 0x26c   : > { %1105 = vmatpush3.bf16.msra.mxu0 %v745_v25  ;;  %1106 = vmatprep.mubr.msk.bf16.mxu0 %vm1429_vm0, %v1428_v0 }
 0x26d   : > { %v645_v29 = vpack.c.bf16 %v641_v28, %v641_v28 }
 0x26e   : > { %v1219_v31 = vpop.eup %1218 }
 0x26f   : > { %1101 = vmatmul.mubr.msk.bf16.vlgmr.msra.gmra.mxu1 %vm599_vm2, %v645_v29  ;;  %v642_v32 = vmul.f32 %v1219_v31, %v1211_v5 }
 0x270   : > { %1111 = vmatpush3.bf16.msra.mxu1 %v791_v30  ;;  %1112 = vmatprep.mubr.msk.bf16.mxu1 %vm1429_vm0, %v1428_v0 }
 0x271   : > { %v646_v33 = vpack.c.bf16 %v642_v32, %v642_v32 }
 0x272   : > { %v1221_v34 = vpop.eup %1220 }
 0x273   : > { %1107 = vmatmul.mubr.msk.bf16.vlgmr.msra.gmra.mxu0 %vm599_vm2, %v646_v33  ;;  %v643_v35 = vmul.f32 %v1221_v34, %v1213_v7 }
 0x275   : > { %v647_v36 = vpack.c.bf16 %v643_v35, %v643_v35 }
 0x277   : > { %1113 = vmatmul.mubr.msk.bf16.vlgmr.msra.gmra.mxu1 %vm599_vm2, %v647_v36 }
 0x32b   : > { %v689_v37 = vpop.f32.mrf.mxu0 }
 0x32d   : > { %v1096_v38 = vpop.f32.mrf.mxu0 }
 0x32f   : > { %v692_v39 = vpop.f32.mrf.mxu0  ;;  %v735_v40 = vpop.f32.mrf.mxu1 }
 0x330   : > { %834 = vrot.lane.b32.xlu0 %v735_v40, %s1430_s24 }
 0x331   : > { %v1097_v41 = vpop.f32.mrf.mxu0  ;;  %v1102_v42 = vpop.f32.mrf.mxu1 }
 0x333   : > { %v738_v43 = vpop.f32.mrf.mxu1  ;;  %v781_v44 = vpop.f32.mrf.mxu0 }
 0x334   : > { %838 = vrot.lane.b32.xlu1 %v781_v44, %s1431_s26 }
 0x335   : > { %v1103_v0 = vpop.f32.mrf.mxu1  ;;  %v1108_v45 = vpop.f32.mrf.mxu0 }
 0x337   : > { %v784_v46 = vpop.f32.mrf.mxu0  ;;  %v827_v47 = vpop.f32.mrf.mxu1 }
 0x338   : > { %842 = vrot.lane.b32.xlu1 %v827_v47, %s1432_s8 }
 0x339   : > { %v1109_v48 = vpop.f32.mrf.mxu0  ;;  %v1114_v49 = vpop.f32.mrf.mxu1 }
 0x33b   : > { %v830_v50 = vpop.f32.mrf.mxu1 }
 0x33d   : > { %v1115_v51 = vpop.f32.mrf.mxu1 }
 0x3a2   : > { %v835_v52 = vpop.permute.xlu0 %834 }
 0x3a3   : > { %v845_v54 = vsel %vm414_vm1, %v689_v37, %v835_v52 }
 0x3a6   : > { %v839_v53 = vpop.permute.xlu1 %838 }
 0x3a7   : > { %v847_v55 = vsel %vm846_vm4, %v845_v54, %v839_v53 }
 0x3aa   : > { %v843_v56 = vpop.permute.xlu1 %842 }
 0x3ab   : > { %v849_v57 = vsel %vm848_vm5, %v847_v55, %v843_v56 }
 0x3ac   : > { %850 = vst [vmem:[%s369_s1] sm:$0xff] %v849_v57 }
 0x3ad   : > { %1345 = shalt.err (!%p1342_p9)
}
 0x3ae   : > { %s1346_s25 = scalar_lea.hbm %s1715_s29, 128  ;;  %s1350_s9 = scalar_lea.hbm %s1762_s5, 256 }
 0x3af   : > { %p1347_p3 = scmp.ne.s32.totalorder %s1715_s29, %s1346_s25  ;;  %p1351_p7 = scmp.lt.s32.totalorder %s1715_s29, %s1762_s5 }
 0x3b0   : > { %p1352_p2 = scmp.lt.s32.totalorder %s1350_s9, %s1346_s25 }
 0x3b1   : > { %p1348_p4 = pnand %p1347_p3, %p1560_p12 }
 0x3b2   : > { %p1353_p11 = por %p1352_p2, %p1351_p7 }
 0x3b3   : > { %p1349_p13 = pneg %p1348_p4 }
 0x3b5   : > { %p1354_p10 = pnand %p1353_p11, %p1349_p13 }
 0x3b7   : > { %1357 = shalt.err (!%p1354_p10)
}
 0x3b8   : > { %1126 = dma.vmem_to_hbm [thread:$0]  (%p1560_p12), %s867_s27, 128, %s1715_s29, %s852_s15  }
 0x3b9 PF: > { %s878_s24 = sand.u32 1, %s1400_s18   ;;  %p1791_p0 = scmp.ne.s32.totalorder %s1781_s11, 0 }
 0x3ba   : > { %p1792_p8 = scmp.ge.s32.totalorder %s1420_s23, 2  ;;  %s879_s26 = scalar_lea.sflag [#allocation4], %s878_s24 }
 0x3bc   : > { %p1143_p5 = pnand %p1792_p8, %p1791_p0 }
 0x3be   : > { %p1144_p1 = pneg %p1143_p5 }
 0x3c0   : > { %1395 = dma.done.wait (%p1144_p1), %s879_s26, 128  }
 0x3c1   : > { %1397 = vsyncadd (%p1144_p1), %s879_s26, 4294967168  ;;  %s25_s23 = sadd.s32 1, %s1420_s23   ;;  %s1793_s10 = sld [smem:[#allocation17_spill]] }
 0x3c2   : > { %p22_p6 = scmp.ge.s32.totalorder %s25_s23, 4   ;;  %s1794_s21 = sld [smem:[#allocation15_spill]] }
 0x3c3   : > { %s1795_s22 = sld [smem:[#allocation16_spill]]  ;;  %s1796_s18 = smov %s1404_s19 }
 0x3c4   : > { %s1797_s19 = smov %s1408_s20  ;;  %24 = sbr.rel (!%p22_p6) target bundleno = 12 (0xc), region = 116 }
 0x3c7   : > { %s1798_s20 = smov %s1793_s10 }
 0x3c9   :  { %884 = vsyncpa [#allocation3], 1 }
 0x3ca   :  { %886 = vsyncpa [#allocation3 + $0x1], 1 }
 0x3cb   :  { %887 = vsyncpa [#allocation6], 1 }
 0x3cc   :  { %889 = vsyncpa [#allocation6 + $0x1], 1 }
 0x3cd   :  { %890 = vsyncpa [#allocation9], 1 }
 0x3ce   :  { %891 = vsyncpa [#allocation4], 1 }
 0x3cf   :  { %893 = vsyncpa [#allocation4 + $0x1], 1 }

</bundles_post_ra>
